<compile_context>
chip_gen: v6e
topology: v6e:2x2x1
jax: 0.10.0
libtpu: 0.0.40
codegen_flags: <defaults>
</compile_context>

<pallas_src>
import math
import jax
import jax.numpy as jnp
from jax import lax
from jax.experimental import pallas as pl
from jax.experimental.pallas import tpu as pltpu

# ----- config (small, consistent with the module) -----
B = 2            # batch
T = 8            # context_length (seq)
D = 32           # emb_dim
H = 4            # n_heads
HD = D // H      # head_dim
FF = 4 * D       # FeedForward hidden dim
BT = B * T       # flattened (batch, seq)
EPS = 1e-5
GELU_C = math.sqrt(2.0 / math.pi)
NEG_INF = -1e30  # finite "minus infinity" for masked scores
T_SHIFT = int(math.log2(T))               # T and BT are powers of two here
assert (1 << T_SHIFT) == T and (BT & (BT - 1)) == 0
# TODO(synk): dropout is identity because cfg['drop_rate'] = 0.0; a p>0 version
#             would use pltpu.prng_seed / pltpu.stateful_bernoulli.


def _layernorm(v, scale, shift):
    mean = jnp.mean(v, axis=-1, keepdims=True)
    var = jnp.mean((v - mean) ** 2, axis=-1, keepdims=True)     # unbiased=False
    return (v - mean) * lax.rsqrt(var + EPS) * scale + shift


def _gelu_tanh(x):
    return 0.5 * x * (1.0 + jnp.tanh(GELU_C * (x + 0.044715 * x * x * x)))


def transformer_block_kernel(
    x_ref,        # [BT, D]   f32   (batch, seq) flattened
    vecs_ref,     # [6, D]    f32   rows: s1, sh1, s2, sh2, bo, b2
    b1_ref,       # [1, FF]   f32   FF layer-1 bias
    wqkv_ref,     # [D, 3D]   bf16  fused Wq|Wk|Wv, Q cols pre-scaled by 1/sqrt(HD)
    wo_ref,       # [D, D]    bf16  out projection
    w1_ref,       # [D, FF]   bf16  FF layer 1
    w2_ref,       # [FF, D]   bf16  FF layer 2
    o_ref,        # [BT, D]   f32
    ctx_ref,      # [BT, D]   bf16  scratch: per-head contexts at lane offsets
):
    x = x_ref[...]
    vecs = vecs_ref[...]
    s1, sh1 = vecs[0:1, :], vecs[1:2, :]
    s2, sh2 = vecs[2:3, :], vecs[3:4, :]
    bo, b2 = vecs[4:5, :], vecs[5:6, :]

    # ---------- sublayer 1: causal multi-head attention ----------
    xn1 = _layernorm(x, s1, sh1)
    qkv = jnp.dot(xn1.astype(jnp.bfloat16), wqkv_ref[...],
                  preferred_element_type=jnp.float32)            # [BT, 3D]
    qkv16 = qkv.astype(jnp.bfloat16)                             # cast once, slice below

    # per-head scores (bf16 operands, trans-b contraction, no XLU transpose),
    # stacked along the sublane axis -> ONE softmax over [H*BT, BT]
    scores = jnp.concatenate(
        [lax.dot_general(qkv16[:, h * HD:(h + 1) * HD],          # q_h (pre-scaled)
                         qkv16[:, D + h * HD:D + (h + 1) * HD],  # k_h
                         (((1,), (1,)), ((), ())),
                         preferred_element_type=jnp.float32)
         for h in range(H)],
        axis=0)                                                  # [H*BT, BT]

    # block-diagonal causal mask built in-kernel (power-of-two T/BT -> shifts/ands)
    r = lax.broadcasted_iota(jnp.int32, (H * BT, BT), 0)
    c = lax.broadcasted_iota(jnp.int32, (H * BT, BT), 1)
    t = jnp.bitwise_and(r, BT - 1)                               # row index within a head
    keep = (jnp.right_shift(t, T_SHIFT) == jnp.right_shift(c, T_SHIFT)) & (c <= t)
    scores = jnp.where(keep, scores, NEG_INF)

    scores = scores - jnp.max(scores, axis=-1, keepdims=True)
    p = jnp.exp(scores)
    p = p * pl.reciprocal(jnp.sum(p, axis=-1, keepdims=True), approx=True)
    p16 = p.astype(jnp.bfloat16)

    # per-head context written to the scratch at lane offset h*HD,
    # then ONE [BT,D] x [D,D] out-projection matmul against full Wo.
    for h in range(H):                                           # static unroll, H=4
        ctx_h = jnp.dot(p16[h * BT:(h + 1) * BT, :],
                        qkv16[:, 2 * D + h * HD:2 * D + (h + 1) * HD],
                        preferred_element_type=jnp.float32)      # [BT, HD]
        ctx_ref[:, h * HD:(h + 1) * HD] = ctx_h.astype(jnp.bfloat16)

    attn = jnp.dot(ctx_ref[...], wo_ref[...],
                   preferred_element_type=jnp.float32)           # [BT, D]
    x1 = attn + bo + x                                           # residual 1

    # ---------- sublayer 2: feed-forward (GELU tanh approx) ----------
    xn2 = _layernorm(x1, s2, sh2)
    hid = jnp.dot(xn2.astype(jnp.bfloat16), w1_ref[...],
                  preferred_element_type=jnp.float32) + b1_ref[...]
    hid = _gelu_tanh(hid)
    ff_out = jnp.dot(hid.astype(jnp.bfloat16), w2_ref[...],
                     preferred_element_type=jnp.float32) + b2

    o_ref[...] = (ff_out + x1).astype(o_ref.dtype)               # residual 2


def transformer_block(x, params):
    vecs, b1, wqkv, wo, w1, w2 = params
    x2d = x.reshape(BT, D)
    vmem = pl.BlockSpec(memory_space=pltpu.MemorySpace.VMEM)
    # TODO(synk): when B*T grows, tile the BT axis with a grid and
    #             dimension_semantics=("parallel",) so v7x's second TC is used.
    out2d = pl.pallas_call(
        transformer_block_kernel,
        out_shape=jax.ShapeDtypeStruct((BT, D), x.dtype),
        in_specs=[vmem] * 7,
        out_specs=vmem,
        scratch_shapes=[pltpu.VMEM((BT, D), jnp.bfloat16)],
    )(x2d, vecs, b1, wqkv, wo, w1, w2)
    return out2d.reshape(B, T, D)


# ---------- pure-JAX reference (mirrors the PyTorch forward, f32 math) ----------
def reference(x, s1, sh1, s2, sh2, wq, wk, wv, wo, bo, w1, b1, w2, b2):
    xn1 = _layernorm(x, s1, sh1)
    q = (xn1 @ wq).reshape(B, T, H, HD).transpose(0, 2, 1, 3)
    k = (xn1 @ wk).reshape(B, T, H, HD).transpose(0, 2, 1, 3)
    v = (xn1 @ wv).reshape(B, T, H, HD).transpose(0, 2, 1, 3)
    scores = jnp.einsum("bhqd,bhkd->bhqk", q, k) / math.sqrt(HD)
    mask = jnp.triu(jnp.ones((T, T), bool), k=1)
    scores = jnp.where(mask, -jnp.inf, scores)
    p = jax.nn.softmax(scores, axis=-1)
    ctx = jnp.einsum("bhqk,bhkd->bhqd", p, v).transpose(0, 2, 1, 3).reshape(B, T, D)
    x1 = ctx @ wo + bo + x
    xn2 = _layernorm(x1, s2, sh2)
    hid = _gelu_tanh(xn2 @ w1 + b1)
    return hid @ w2 + b2 + x1


if __name__ == "__main__":
    key = jax.random.PRNGKey(0)
    keys = jax.random.split(key, 16)

    x = jax.random.normal(keys[0], (B, T, D), jnp.float32)

    # deterministic synthetic parameters (module __init__ only fixes shapes)
    s1 = jnp.ones((1, D), jnp.float32) + 0.05 * jax.random.normal(keys[1], (1, D))
    sh1 = 0.05 * jax.random.normal(keys[2], (1, D))
    s2 = jnp.ones((1, D), jnp.float32) + 0.05 * jax.random.normal(keys[3], (1, D))
    sh2 = 0.05 * jax.random.normal(keys[4], (1, D))
    wq = 0.02 * jax.random.normal(keys[5], (D, D))    # qkv_bias=False -> no q/k/v bias
    wk = 0.02 * jax.random.normal(keys[6], (D, D))
    wv = 0.02 * jax.random.normal(keys[7], (D, D))
    wo = 0.02 * jax.random.normal(keys[8], (D, D))
    bo = 0.02 * jax.random.normal(keys[9], (1, D))
    w1 = 0.02 * jax.random.normal(keys[10], (D, FF))
    b1 = 0.02 * jax.random.normal(keys[11], (1, FF))
    w2 = 0.02 * jax.random.normal(keys[12], (FF, D))
    b2 = 0.02 * jax.random.normal(keys[13], (1, D))

    # kernel-side packing:
    #   * fused QKV weight with 1/sqrt(HD) folded into the Q columns, bf16
    #   * all matrix weights stored bf16 (MXU operand dtype); biases/LN stay f32
    #   * six tiny [1,D] vectors packed into one [6,D] input
    inv_sqrt = 1.0 / math.sqrt(HD)
    wqkv = jnp.concatenate([wq * inv_sqrt, wk, wv], axis=1).astype(jnp.bfloat16)
    vecs = jnp.concatenate([s1, sh1, s2, sh2, bo, b2], axis=0)          # [6, D]
    params = (vecs, b1, wqkv,
              wo.astype(jnp.bfloat16), w1.astype(jnp.bfloat16), w2.astype(jnp.bfloat16))

    out = jax.block_until_ready(transformer_block(x, params))
    ref = reference(x, s1, sh1, s2, sh2, wq, wk, wv, wo, bo, w1, b1, w2, b2)

    assert out.shape == (B, T, D) and out.dtype == jnp.float32
    max_err = float(jnp.max(jnp.abs(out - ref)))
    # bf16 weight storage + bf16 MXU operands + approx reciprocal => ~1e-3 error
    assert jnp.allclose(out, ref, atol=1e-2, rtol=1e-2), max_err

    print("KERNEL_OK")
</pallas_src>

<mosaic_0001>
module attributes {stable_mosaic.version = 11 : i64} {
  func.func @transformer_block_kernel(%arg0: memref<16x32xf32, #tpu.memory_space<vmem>>, %arg1: memref<6x32xf32, #tpu.memory_space<vmem>>, %arg2: memref<1x128xf32, #tpu.memory_space<vmem>>, %arg3: memref<32x96xbf16, #tpu.memory_space<vmem>>, %arg4: memref<32x32xbf16, #tpu.memory_space<vmem>>, %arg5: memref<32x128xbf16, #tpu.memory_space<vmem>>, %arg6: memref<128x32xbf16, #tpu.memory_space<vmem>>, %arg7: memref<16x32xf32, #tpu.memory_space<vmem>>, %arg8: memref<16x32xbf16, #tpu.memory_space<vmem>>) attributes {dimension_semantics = [], scalar_prefetch = 0 : i64, scratch_operands = 1 : i64, tpu.core_type = #tpu.core_type<tc>} {
    %c0 = arith.constant 0 : index
    %c0_0 = arith.constant 0 : index
    %0 = vector.load %arg0[%c0, %c0_0] : memref<16x32xf32, #tpu.memory_space<vmem>>, vector<16x32xf32>
    %c0_1 = arith.constant 0 : index
    %c0_2 = arith.constant 0 : index
    %1 = vector.load %arg1[%c0_1, %c0_2] : memref<6x32xf32, #tpu.memory_space<vmem>>, vector<6x32xf32>
    %2 = vector.extract_strided_slice %1 {offsets = [0, 0], sizes = [1, 32], strides = [1, 1]} : vector<6x32xf32> to vector<1x32xf32>
    %3 = vector.extract_strided_slice %1 {offsets = [1, 0], sizes = [1, 32], strides = [1, 1]} : vector<6x32xf32> to vector<1x32xf32>
    %4 = vector.extract_strided_slice %1 {offsets = [2, 0], sizes = [1, 32], strides = [1, 1]} : vector<6x32xf32> to vector<1x32xf32>
    %5 = vector.extract_strided_slice %1 {offsets = [3, 0], sizes = [1, 32], strides = [1, 1]} : vector<6x32xf32> to vector<1x32xf32>
    %6 = vector.extract_strided_slice %1 {offsets = [4, 0], sizes = [1, 32], strides = [1, 1]} : vector<6x32xf32> to vector<1x32xf32>
    %7 = vector.extract_strided_slice %1 {offsets = [5, 0], sizes = [1, 32], strides = [1, 1]} : vector<6x32xf32> to vector<1x32xf32>
    %cst = arith.constant dense<0.000000e+00> : vector<16xf32>
    %8 = vector.multi_reduction <add>, %0, %cst [1] : vector<16x32xf32> to vector<16xf32>
    %9 = vector.shape_cast %8 : vector<16xf32> to vector<16x1xf32>
    %cst_3 = arith.constant 3.200000e+01 : f32
    %10 = vector.broadcast %cst_3 : f32 to vector<16x1xf32>
    %11 = arith.divf %9, %10 : vector<16x1xf32>
    %12 = vector.broadcast %11 : vector<16x1xf32> to vector<16x32xf32>
    %13 = arith.subf %0, %12 : vector<16x32xf32>
    %14 = arith.mulf %13, %13 : vector<16x32xf32>
    %cst_4 = arith.constant dense<0.000000e+00> : vector<16xf32>
    %15 = vector.multi_reduction <add>, %14, %cst_4 [1] : vector<16x32xf32> to vector<16xf32>
    %16 = vector.shape_cast %15 : vector<16xf32> to vector<16x1xf32>
    %cst_5 = arith.constant 3.200000e+01 : f32
    %17 = vector.broadcast %cst_5 : f32 to vector<16x1xf32>
    %18 = arith.divf %16, %17 : vector<16x1xf32>
    %19 = vector.broadcast %11 : vector<16x1xf32> to vector<16x32xf32>
    %20 = arith.subf %0, %19 : vector<16x32xf32>
    %cst_6 = arith.constant 9.99999974E-6 : f32
    %21 = vector.broadcast %cst_6 : f32 to vector<16x1xf32>
    %22 = arith.addf %18, %21 : vector<16x1xf32>
    %23 = math.rsqrt %22 : vector<16x1xf32>
    %24 = vector.broadcast %23 : vector<16x1xf32> to vector<16x32xf32>
    %25 = arith.mulf %20, %24 : vector<16x32xf32>
    %26 = vector.broadcast %2 : vector<1x32xf32> to vector<16x32xf32>
    %27 = arith.mulf %25, %26 : vector<16x32xf32>
    %28 = vector.broadcast %3 : vector<1x32xf32> to vector<16x32xf32>
    %29 = arith.addf %27, %28 : vector<16x32xf32>
    %30 = arith.truncf %29 : vector<16x32xf32> to vector<16x32xbf16>
    %c0_7 = arith.constant 0 : index
    %c0_8 = arith.constant 0 : index
    %31 = vector.load %arg3[%c0_7, %c0_8] : memref<32x96xbf16, #tpu.memory_space<vmem>>, vector<32x96xbf16>
    %cst_9 = arith.constant dense<0.000000e+00> : vector<16x96xf32>
    %32 = tpu.matmul %30, %31, %cst_9 {dimension_numbers = #tpu.dot_dimension_numbers<[1], [0], [0], [1], [0, 0, 1, 1], [], []>} : vector<16x32xbf16>, vector<32x96xbf16>, vector<16x96xf32> -> vector<16x96xf32>
    %33 = arith.truncf %32 : vector<16x96xf32> to vector<16x96xbf16>
    %34 = vector.extract_strided_slice %33 {offsets = [0, 0], sizes = [16, 8], strides = [1, 1]} : vector<16x96xbf16> to vector<16x8xbf16>
    %35 = vector.extract_strided_slice %33 {offsets = [0, 32], sizes = [16, 8], strides = [1, 1]} : vector<16x96xbf16> to vector<16x8xbf16>
    %cst_10 = arith.constant dense<0.000000e+00> : vector<16x16xf32>
    %36 = tpu.matmul %34, %35, %cst_10 {dimension_numbers = #tpu.dot_dimension_numbers<[1], [1], [0], [0], [0, 0, 1, 0], [], []>} : vector<16x8xbf16>, vector<16x8xbf16>, vector<16x16xf32> -> vector<16x16xf32>
    %37 = vector.extract_strided_slice %33 {offsets = [0, 8], sizes = [16, 8], strides = [1, 1]} : vector<16x96xbf16> to vector<16x8xbf16>
    %38 = vector.extract_strided_slice %33 {offsets = [0, 40], sizes = [16, 8], strides = [1, 1]} : vector<16x96xbf16> to vector<16x8xbf16>
    %cst_11 = arith.constant dense<0.000000e+00> : vector<16x16xf32>
    %39 = tpu.matmul %37, %38, %cst_11 {dimension_numbers = #tpu.dot_dimension_numbers<[1], [1], [0], [0], [0, 0, 1, 0], [], []>} : vector<16x8xbf16>, vector<16x8xbf16>, vector<16x16xf32> -> vector<16x16xf32>
    %40 = vector.extract_strided_slice %33 {offsets = [0, 16], sizes = [16, 8], strides = [1, 1]} : vector<16x96xbf16> to vector<16x8xbf16>
    %41 = vector.extract_strided_slice %33 {offsets = [0, 48], sizes = [16, 8], strides = [1, 1]} : vector<16x96xbf16> to vector<16x8xbf16>
    %cst_12 = arith.constant dense<0.000000e+00> : vector<16x16xf32>
    %42 = tpu.matmul %40, %41, %cst_12 {dimension_numbers = #tpu.dot_dimension_numbers<[1], [1], [0], [0], [0, 0, 1, 0], [], []>} : vector<16x8xbf16>, vector<16x8xbf16>, vector<16x16xf32> -> vector<16x16xf32>
    %43 = vector.extract_strided_slice %33 {offsets = [0, 24], sizes = [16, 8], strides = [1, 1]} : vector<16x96xbf16> to vector<16x8xbf16>
    %44 = vector.extract_strided_slice %33 {offsets = [0, 56], sizes = [16, 8], strides = [1, 1]} : vector<16x96xbf16> to vector<16x8xbf16>
    %cst_13 = arith.constant dense<0.000000e+00> : vector<16x16xf32>
    %45 = tpu.matmul %43, %44, %cst_13 {dimension_numbers = #tpu.dot_dimension_numbers<[1], [1], [0], [0], [0, 0, 1, 0], [], []>} : vector<16x8xbf16>, vector<16x8xbf16>, vector<16x16xf32> -> vector<16x16xf32>
    %46 = tpu.concatenate %36, %39, %42, %45 in 0 : vector<16x16xf32>, vector<16x16xf32>, vector<16x16xf32>, vector<16x16xf32> -> vector<64x16xf32>
    %47 = tpu.iota {dimensions = array<i32: 0>} : vector<64x16xi32>
    %48 = tpu.iota {dimensions = array<i32: 1>} : vector<64x16xi32>
    %c15_i32 = arith.constant 15 : i32
    %49 = vector.broadcast %c15_i32 : i32 to vector<64x16xi32>
    %50 = arith.andi %47, %49 : vector<64x16xi32>
    %c3_i32 = arith.constant 3 : i32
    %51 = vector.broadcast %c3_i32 : i32 to vector<64x16xi32>
    %52 = arith.shrsi %50, %51 : vector<64x16xi32>
    %c3_i32_14 = arith.constant 3 : i32
    %53 = vector.broadcast %c3_i32_14 : i32 to vector<64x16xi32>
    %54 = arith.shrsi %48, %53 : vector<64x16xi32>
    %55 = arith.cmpi eq, %52, %54 : vector<64x16xi32>
    %56 = arith.cmpi sle, %48, %50 : vector<64x16xi32>
    %57 = arith.andi %55, %56 : vector<64x16xi1>
    %cst_15 = arith.constant -1.000000e+30 : f32
    %58 = vector.broadcast %cst_15 : f32 to vector<64x16xf32>
    %59 = arith.select %57, %46, %58 : vector<64x16xi1>, vector<64x16xf32>
    %cst_16 = arith.constant dense<0xFF800000> : vector<64xf32>
    %60 = vector.multi_reduction <maximumf>, %59, %cst_16 [1] : vector<64x16xf32> to vector<64xf32>
    %61 = vector.shape_cast %60 : vector<64xf32> to vector<64x1xf32>
    %62 = vector.broadcast %61 : vector<64x1xf32> to vector<64x16xf32>
    %63 = arith.subf %59, %62 : vector<64x16xf32>
    %64 = math.exp %63 : vector<64x16xf32>
    %cst_17 = arith.constant dense<0.000000e+00> : vector<64xf32>
    %65 = vector.multi_reduction <add>, %64, %cst_17 [1] : vector<64x16xf32> to vector<64xf32>
    %66 = vector.shape_cast %65 : vector<64xf32> to vector<64x1xf32>
    %67 = tpu.reciprocal %66 {approx = true} : vector<64x1xf32> -> vector<64x1xf32>
    %68 = vector.broadcast %67 : vector<64x1xf32> to vector<64x16xf32>
    %69 = arith.mulf %64, %68 : vector<64x16xf32>
    %70 = arith.truncf %69 : vector<64x16xf32> to vector<64x16xbf16>
    %71 = vector.extract_strided_slice %70 {offsets = [0, 0], sizes = [16, 16], strides = [1, 1]} : vector<64x16xbf16> to vector<16x16xbf16>
    %72 = vector.extract_strided_slice %33 {offsets = [0, 64], sizes = [16, 8], strides = [1, 1]} : vector<16x96xbf16> to vector<16x8xbf16>
    %cst_18 = arith.constant dense<0.000000e+00> : vector<16x8xf32>
    %73 = tpu.matmul %71, %72, %cst_18 {dimension_numbers = #tpu.dot_dimension_numbers<[1], [0], [0], [1], [0, 0, 1, 1], [], []>} : vector<16x16xbf16>, vector<16x8xbf16>, vector<16x8xf32> -> vector<16x8xf32>
    %74 = arith.truncf %73 : vector<16x8xf32> to vector<16x8xbf16>
    %c0_19 = arith.constant 0 : index
    %c0_20 = arith.constant 0 : index
    %75 = vector.load %arg8[%c0_19, %c0_20] : memref<16x32xbf16, #tpu.memory_space<vmem>>, vector<16x8xbf16>
    tpu.vector_store %arg8[%c0_19, %c0_20], %74 {strides = array<i32>} : memref<16x32xbf16, #tpu.memory_space<vmem>>, vector<16x8xbf16>,
    %76 = vector.extract_strided_slice %70 {offsets = [16, 0], sizes = [16, 16], strides = [1, 1]} : vector<64x16xbf16> to vector<16x16xbf16>
    %77 = vector.extract_strided_slice %33 {offsets = [0, 72], sizes = [16, 8], strides = [1, 1]} : vector<16x96xbf16> to vector<16x8xbf16>
    %cst_21 = arith.constant dense<0.000000e+00> : vector<16x8xf32>
    %78 = tpu.matmul %76, %77, %cst_21 {dimension_numbers = #tpu.dot_dimension_numbers<[1], [0], [0], [1], [0, 0, 1, 1], [], []>} : vector<16x16xbf16>, vector<16x8xbf16>, vector<16x8xf32> -> vector<16x8xf32>
    %79 = arith.truncf %78 : vector<16x8xf32> to vector<16x8xbf16>
    %c0_22 = arith.constant 0 : index
    %c8 = arith.constant 8 : index
    %80 = vector.load %arg8[%c0_22, %c8] : memref<16x32xbf16, #tpu.memory_space<vmem>>, vector<16x8xbf16>
    tpu.vector_store %arg8[%c0_22, %c8], %79 {strides = array<i32>} : memref<16x32xbf16, #tpu.memory_space<vmem>>, vector<16x8xbf16>,
    %81 = vector.extract_strided_slice %70 {offsets = [32, 0], sizes = [16, 16], strides = [1, 1]} : vector<64x16xbf16> to vector<16x16xbf16>
    %82 = vector.extract_strided_slice %33 {offsets = [0, 80], sizes = [16, 8], strides = [1, 1]} : vector<16x96xbf16> to vector<16x8xbf16>
    %cst_23 = arith.constant dense<0.000000e+00> : vector<16x8xf32>
    %83 = tpu.matmul %81, %82, %cst_23 {dimension_numbers = #tpu.dot_dimension_numbers<[1], [0], [0], [1], [0, 0, 1, 1], [], []>} : vector<16x16xbf16>, vector<16x8xbf16>, vector<16x8xf32> -> vector<16x8xf32>
    %84 = arith.truncf %83 : vector<16x8xf32> to vector<16x8xbf16>
    %c0_24 = arith.constant 0 : index
    %c16 = arith.constant 16 : index
    %85 = vector.load %arg8[%c0_24, %c16] : memref<16x32xbf16, #tpu.memory_space<vmem>>, vector<16x8xbf16>
    tpu.vector_store %arg8[%c0_24, %c16], %84 {strides = array<i32>} : memref<16x32xbf16, #tpu.memory_space<vmem>>, vector<16x8xbf16>,
    %86 = vector.extract_strided_slice %70 {offsets = [48, 0], sizes = [16, 16], strides = [1, 1]} : vector<64x16xbf16> to vector<16x16xbf16>
    %87 = vector.extract_strided_slice %33 {offsets = [0, 88], sizes = [16, 8], strides = [1, 1]} : vector<16x96xbf16> to vector<16x8xbf16>
    %cst_25 = arith.constant dense<0.000000e+00> : vector<16x8xf32>
    %88 = tpu.matmul %86, %87, %cst_25 {dimension_numbers = #tpu.dot_dimension_numbers<[1], [0], [0], [1], [0, 0, 1, 1], [], []>} : vector<16x16xbf16>, vector<16x8xbf16>, vector<16x8xf32> -> vector<16x8xf32>
    %89 = arith.truncf %88 : vector<16x8xf32> to vector<16x8xbf16>
    %c0_26 = arith.constant 0 : index
    %c24 = arith.constant 24 : index
    %90 = vector.load %arg8[%c0_26, %c24] : memref<16x32xbf16, #tpu.memory_space<vmem>>, vector<16x8xbf16>
    tpu.vector_store %arg8[%c0_26, %c24], %89 {strides = array<i32>} : memref<16x32xbf16, #tpu.memory_space<vmem>>, vector<16x8xbf16>,
    %c0_27 = arith.constant 0 : index
    %c0_28 = arith.constant 0 : index
    %91 = vector.load %arg8[%c0_27, %c0_28] : memref<16x32xbf16, #tpu.memory_space<vmem>>, vector<16x32xbf16>
    %c0_29 = arith.constant 0 : index
    %c0_30 = arith.constant 0 : index
    %92 = vector.load %arg4[%c0_29, %c0_30] : memref<32x32xbf16, #tpu.memory_space<vmem>>, vector<32x32xbf16>
    %cst_31 = arith.constant dense<0.000000e+00> : vector<16x32xf32>
    %93 = tpu.matmul %91, %92, %cst_31 {dimension_numbers = #tpu.dot_dimension_numbers<[1], [0], [0], [1], [0, 0, 1, 1], [], []>} : vector<16x32xbf16>, vector<32x32xbf16>, vector<16x32xf32> -> vector<16x32xf32>
    %94 = vector.broadcast %6 : vector<1x32xf32> to vector<16x32xf32>
    %95 = arith.addf %93, %94 : vector<16x32xf32>
    %96 = arith.addf %95, %0 : vector<16x32xf32>
    %cst_32 = arith.constant dense<0.000000e+00> : vector<16xf32>
    %97 = vector.multi_reduction <add>, %96, %cst_32 [1] : vector<16x32xf32> to vector<16xf32>
    %98 = vector.shape_cast %97 : vector<16xf32> to vector<16x1xf32>
    %cst_33 = arith.constant 3.200000e+01 : f32
    %99 = vector.broadcast %cst_33 : f32 to vector<16x1xf32>
    %100 = arith.divf %98, %99 : vector<16x1xf32>
    %101 = vector.broadcast %100 : vector<16x1xf32> to vector<16x32xf32>
    %102 = arith.subf %96, %101 : vector<16x32xf32>
    %103 = arith.mulf %102, %102 : vector<16x32xf32>
    %cst_34 = arith.constant dense<0.000000e+00> : vector<16xf32>
    %104 = vector.multi_reduction <add>, %103, %cst_34 [1] : vector<16x32xf32> to vector<16xf32>
    %105 = vector.shape_cast %104 : vector<16xf32> to vector<16x1xf32>
    %cst_35 = arith.constant 3.200000e+01 : f32
    %106 = vector.broadcast %cst_35 : f32 to vector<16x1xf32>
    %107 = arith.divf %105, %106 : vector<16x1xf32>
    %108 = vector.broadcast %100 : vector<16x1xf32> to vector<16x32xf32>
    %109 = arith.subf %96, %108 : vector<16x32xf32>
    %cst_36 = arith.constant 9.99999974E-6 : f32
    %110 = vector.broadcast %cst_36 : f32 to vector<16x1xf32>
    %111 = arith.addf %107, %110 : vector<16x1xf32>
    %112 = math.rsqrt %111 : vector<16x1xf32>
    %113 = vector.broadcast %112 : vector<16x1xf32> to vector<16x32xf32>
    %114 = arith.mulf %109, %113 : vector<16x32xf32>
    %115 = vector.broadcast %4 : vector<1x32xf32> to vector<16x32xf32>
    %116 = arith.mulf %114, %115 : vector<16x32xf32>
    %117 = vector.broadcast %5 : vector<1x32xf32> to vector<16x32xf32>
    %118 = arith.addf %116, %117 : vector<16x32xf32>
    %119 = arith.truncf %118 : vector<16x32xf32> to vector<16x32xbf16>
    %c0_37 = arith.constant 0 : index
    %c0_38 = arith.constant 0 : index
    %120 = vector.load %arg5[%c0_37, %c0_38] : memref<32x128xbf16, #tpu.memory_space<vmem>>, vector<32x128xbf16>
    %cst_39 = arith.constant dense<0.000000e+00> : vector<16x128xf32>
    %121 = tpu.matmul %119, %120, %cst_39 {dimension_numbers = #tpu.dot_dimension_numbers<[1], [0], [0], [1], [0, 0, 1, 1], [], []>} : vector<16x32xbf16>, vector<32x128xbf16>, vector<16x128xf32> -> vector<16x128xf32>
    %c0_40 = arith.constant 0 : index
    %c0_41 = arith.constant 0 : index
    %122 = vector.load %arg2[%c0_40, %c0_41] : memref<1x128xf32, #tpu.memory_space<vmem>>, vector<1x128xf32>
    %123 = vector.broadcast %122 : vector<1x128xf32> to vector<16x128xf32>
    %124 = arith.addf %121, %123 : vector<16x128xf32>
    %cst_42 = arith.constant 5.000000e-01 : f32
    %125 = vector.broadcast %cst_42 : f32 to vector<16x128xf32>
    %126 = arith.mulf %125, %124 : vector<16x128xf32>
    %cst_43 = arith.constant 4.471500e-02 : f32
    %127 = vector.broadcast %cst_43 : f32 to vector<16x128xf32>
    %128 = arith.mulf %127, %124 : vector<16x128xf32>
    %129 = arith.mulf %128, %124 : vector<16x128xf32>
    %130 = arith.mulf %129, %124 : vector<16x128xf32>
    %131 = arith.addf %124, %130 : vector<16x128xf32>
    %cst_44 = arith.constant 0.797884583 : f32
    %132 = vector.broadcast %cst_44 : f32 to vector<16x128xf32>
    %133 = arith.mulf %132, %131 : vector<16x128xf32>
    %134 = math.tanh %133 : vector<16x128xf32>
    %cst_45 = arith.constant 1.000000e+00 : f32
    %135 = vector.broadcast %cst_45 : f32 to vector<16x128xf32>
    %136 = arith.addf %135, %134 : vector<16x128xf32>
    %137 = arith.mulf %126, %136 : vector<16x128xf32>
    %138 = arith.truncf %137 : vector<16x128xf32> to vector<16x128xbf16>
    %c0_46 = arith.constant 0 : index
    %c0_47 = arith.constant 0 : index
    %139 = vector.load %arg6[%c0_46, %c0_47] : memref<128x32xbf16, #tpu.memory_space<vmem>>, vector<128x32xbf16>
    %cst_48 = arith.constant dense<0.000000e+00> : vector<16x32xf32>
    %140 = tpu.matmul %138, %139, %cst_48 {dimension_numbers = #tpu.dot_dimension_numbers<[1], [0], [0], [1], [0, 0, 1, 1], [], []>} : vector<16x128xbf16>, vector<128x32xbf16>, vector<16x32xf32> -> vector<16x32xf32>
    %141 = vector.broadcast %7 : vector<1x32xf32> to vector<16x32xf32>
    %142 = arith.addf %140, %141 : vector<16x32xf32>
    %143 = arith.addf %142, %96 : vector<16x32xf32>
    %c0_49 = arith.constant 0 : index
    %c0_50 = arith.constant 0 : index
    %144 = vector.load %arg7[%c0_49, %c0_50] : memref<16x32xf32, #tpu.memory_space<vmem>>, vector<16x32xf32>
    tpu.vector_store %arg7[%c0_49, %c0_50], %143 {strides = array<i32>} : memref<16x32xf32, #tpu.memory_space<vmem>>, vector<16x32xf32>,
    return
  }
}

</mosaic_0001>

<bundles_post_ra>
// kernel: tpu_custom_call.1
= control target key start
LH: loop header
LB: loop body
LE: loop exit
PB: predicated region body
PF: predicated region fallthrough
CT: control target
= control target key end

     0   :  { %vm31_vm0 = vcmask 261120   ;;  %s1633_s0 = inlined_call_operand.vmem [shape: f32[16,32], index: 0, kind: input, shape index: {}]   ;;  %s1634_s1 = inlined_call_operand.vmem [shape: f32[6,32], index: 1, kind: input, shape index: {}]   ;;  %s1635_s2 = inlined_call_operand.vmem [shape: f32[1,128], index: 2, kind: input, shape index: {}]   ;;  %s1636_s3 = inlined_call_operand.vmem [shape: bf16[32,96], index: 3, kind: input, shape index: {}]   ;;  %s1637_s4 = inlined_call_operand.vmem [shape: bf16[32,32], index: 4, kind: input, shape index: {}]   ;;  %s1638_s5 = inlined_call_operand.vmem [shape: bf16[32,128], index: 5, kind: input, shape index: {}]   ;;  %s1639_s6 = inlined_call_operand.vmem [shape: bf16[128,32], index: 6, kind: input, shape index: {}]   ;;  %s1640_s7 = inlined_call_operand.hbm [shape: f32[16,32], index: 7, kind: output, shape index: {}]  }
   0x1   :  { %v1390_v0 = vld [vmem:[%s1633_s0] sm:$0xff]  ;;  %v1395_v1 = vld [vmem:[%s1633_s0 + $0x8] sm:$0xff] }
   0x2   :  { %v32_v2 = vsel %vm31_vm0, %v1390_v0, 0.0  ;;  %v35_v3 = vsel %vm31_vm0, %v1395_v1, 0.0 }
   0x3   :  { %33 = vadd.xlane.f32.xlu0 %v32_v2 }
   0x7   :  { %36 = vadd.xlane.f32.xlu0 %v35_v3 }
   0x8   :  { %12 = vsyncpa [#allocation4], 0  ;;  %v1248_v14 = vld [vmem:[%s1636_s3 + $0x8] sm:$0xff]   ;;  %v1329_v15 = vmov 0.0   ;;  %vm1330_vm1 = vmmov 0   ;;  %v1249_v16 = vld [vmem:[%s1636_s3] sm:$0xff]   ;;  %v59_v23 = vlaneseq }
   0x9   :  { %1138 = vmatprep.subr.bf16.mxu0 %v1329_v15  ;;  %1142 = vmatprep.mubr.msk.bf16.mxu0 %vm1330_vm1, %v1329_v15  ;;  %v1426_v26 = vld [vmem:[%s1634_s1] sm:$0x3f]  ;;  %s1331_s1 = smov 88   ;;  %s1332_s9 = smov 96   ;;  %vm136_vm2 = vcmask 64512   ;;  %vm397_vm6 = vcmask 130048  }
   0xa   :  { %1139 = vmatpush3.bf16.msra.mxu0 %v1248_v14  ;;  %1158 = vmatprep.subr.bf16.mxu1 %v1329_v15  ;;  %v1420_v24 = vshrl.u32 %v59_v23, 7  ;;  %s1333_s10 = smov 80   ;;  %s1334_s11 = smov 72   ;;  %v1467_v57 = vand.u32 127, %v59_v23 }
   0xb   :  { %1140 = vmatprep.subr.bf16.mxu0 %v1329_v15  ;;  %1160 = vmatprep.mubr.msk.bf16.mxu1 %vm1330_vm1, %v1329_v15  ;;  %s1335_s12 = smov 120   ;;  %s1336_s13 = smov 104  }
   0xc   :  { %v61_v25 = vsub.s32 0, %v1420_v24  ;;  %v67_v30 = vsub.s32 1, %v1420_v24  ;;  %s1337_s14 = smov 112   ;;  %v339_v55 = vadd.s32 8, %v1420_v24  ;;  %v342_v56 = vadd.s32 32, %v1420_v24  ;;  %s1338_s15 = smov 64  }
   0xd   :  { %v348_v58 = vand.u32 15, %v1420_v24  ;;  %v1471_v62 = vshra.s32 %v1467_v57, 3  ;;  %v340_v63 = vadd.s32 16, %v1420_v24  ;;  %s1339_s16 = smov 48   ;;  %s1340_s17 = smov 40  }
   0xe   :  { %1141 = vmatpush3.bf16.msra.mxu0 %v1249_v16  ;;  %v62_v29 = vrot.slane %v1426_v26, %v61_v25  ;;  %v68_v34 = vrot.slane %v1426_v26, %v67_v30  ;;  %v349_v59 = vand.u32 15, %v339_v55  ;;  %v352_v60 = vand.u32 15, %v342_v56  ;;  %s1341_s18 = smov 56   ;;  %s1342_s21 = smov 8  }
   0xf   :  { %1146 = vmatprep.subr.bf16.mxu0 %v1329_v15  ;;  %v356_v61 = vshra.s32 %v348_v58, 3  ;;  %vm373_vm4 = vcmp.le.s32.totalorder %v1467_v57, %v348_v58  ;;  %s1343_s24 = smov 16   ;;  %s1344_s25 = smov 24  }
  0x10   :  { %v357_v2 = vshra.s32 %v349_v59, 3  ;;  %v360_v3 = vshra.s32 %v352_v60, 3  ;;  %vm374_vm8 = vcmp.le.s32.totalorder %v1467_v57, %v349_v59  ;;  %vm377_vm10 = vcmp.le.s32.totalorder %v1467_v57, %v352_v60 }
  0x11   :  { %vm365_vm3 = vcmp.eq.s32.totalorder %v356_v61, %v1471_v62 }
  0x12   :  { %vm381_vm5 = vmand %vm365_vm3, %vm373_vm4  ;;  %vm366_vm7 = vcmp.eq.s32.totalorder %v357_v2, %v1471_v62  ;;  %vm369_vm9 = vcmp.eq.s32.totalorder %v360_v3, %v1471_v62 }
  0x13   :  { %vm382_vm11 = vmand %vm366_vm7, %vm374_vm8 }
  0x14   :  { %vm385_vm12 = vmand %vm369_vm9, %vm377_vm10 }
  0x8c   :  { %v34_v4 = vpop.xlane.xlu0 %33 }
  0x8d   :  { %v39_v5 = vmul.f32 0.03125, %v34_v4  ;;  %v350_v4 = vand.u32 15, %v340_v63 }
  0x8f   :  { %v41_v6 = vsub.f32 %v1390_v0, %v39_v5  ;;  %v341_v5 = vadd.s32 24, %v1420_v24  ;;  %vm1488_vm13 = vcmp.le.s32.totalorder %v1467_v57, %v350_v4 }
  0x90   :  { %v37_v7 = vpop.xlane.xlu0 %36 }
  0x91   :  { %v40_v8 = vmul.f32 0.03125, %v37_v7  ;;  %v43_v9 = vmul.f32 %v41_v6, %v41_v6  ;;  %v358_v7 = vshra.s32 %v350_v4, 3 }
  0x93   :  { %v42_v10 = vsub.f32 %v1395_v1, %v40_v8  ;;  %v45_v11 = vsel %vm31_vm0, %v43_v9, 0.0  ;;  %v351_v8 = vand.u32 15, %v341_v5  ;;  %v344_v9 = vadd.s32 48, %v1420_v24 }
  0x94   :  { %46 = vadd.xlane.f32.xlu1 %v45_v11  ;;  %vm367_vm14 = vcmp.eq.s32.totalorder %v358_v7, %v1471_v62 }
  0x95   :  { %v44_v12 = vmul.f32 %v42_v10, %v42_v10  ;;  %vm383_vm15 = vmand %vm367_vm14, %vm1488_vm13  ;;  %vm376_vm3 = vcmp.le.s32.totalorder %v1467_v57, %v351_v8 }
  0x97   :  { %v48_v13 = vsel %vm31_vm0, %v44_v12, 0.0 }
  0x98   :  { %49 = vadd.xlane.f32.xlu1 %v48_v13 }
 0x11d   :  { %v47_v17 = vpop.xlane.xlu1 %46 }
 0x11e   :  { %v51_v18 = vmul.f32 0.03125, %v47_v17  ;;  %v359_v17 = vshra.s32 %v351_v8, 3 }
 0x120   :  { %v53_v19 = vadd.f32 1e-05, %v51_v18  ;;  %v354_v18 = vand.u32 15, %v344_v9 }
 0x121   :  { %v50_v20 = vpop.xlane.xlu1 %49 }
 0x122   :  { %1263 = vrsqrt.f32 %v53_v19  ;;  %v52_v21 = vmul.f32 0.03125, %v50_v20  ;;  %v345_v19 = vadd.s32 56, %v1420_v24  ;;  %vm379_vm9 = vcmp.le.s32.totalorder %v1467_v57, %v354_v18 }
 0x124   :  { %v54_v22 = vadd.f32 1e-05, %v52_v21 }
 0x126   :  { %1265 = vrsqrt.f32 %v54_v22 }
 0x12f   :  { %v1264_v27 = vpop.eup %1263 }
 0x130   :  { %v57_v28 = vmul.f32 %v1264_v27, %v41_v6  ;;  %v343_v6 = vadd.s32 40, %v1420_v24 }
 0x132   :  { %v63_v33 = vmul.f32 %v62_v29, %v57_v28  ;;  %v353_v12 = vand.u32 15, %v343_v6 }
 0x133   :  { %v1266_v31 = vpop.eup %1265 }
 0x134   :  { %v58_v32 = vmul.f32 %v1266_v31, %v42_v10  ;;  %v69_v36 = vadd.f32 %v68_v34, %v63_v33  ;;  %v361_v25 = vshra.s32 %v353_v12, 3  ;;  %v362_v31 = vshra.s32 %v354_v18, 3 }
 0x136   :  { %v64_v35 = vmul.f32 %v62_v29, %v58_v32  ;;  %v355_v32 = vand.u32 15, %v345_v19  ;;  %vm370_vm4 = vcmp.eq.s32.totalorder %v361_v25, %v1471_v62  ;;  %vm371_vm8 = vcmp.eq.s32.totalorder %v362_v31, %v1471_v62 }
 0x138   :  { %v70_v37 = vadd.f32 %v68_v34, %v64_v35  ;;  %vm380_vm13 = vcmp.le.s32.totalorder %v1467_v57, %v355_v32 }
 0x13a   :  { %v71_v38 = vpack.c.bf16 %v70_v37, %v69_v36 }
 0x13c   :  { %1143 = vmatmul.mubr.msk.bf16.vlgmr.msra.gmra.mxu0 %vm31_vm0, %v71_v38 }
 0x13d   :  { %1148 = vmatprep.mubr.msk.bf16.mxu0 %vm1330_vm1, %v1329_v15 }
 0x1fc   :  { %v125_v39 = vpop.f32.mrf.mxu0 }
 0x1fe   :  { %v1144_v40 = vpop.f32.mrf.mxu0 }
 0x200   :  { %v128_v41 = vpop.f32.mrf.mxu0 }
 0x201   :  { %v1434_v42 = vpack.c.bf16 %v128_v41, %v125_v39  ;;  %v363_v39 = vshra.s32 %v355_v32, 3 }
 0x202   :  { %v1145_v43 = vpop.f32.mrf.mxu0 }
 0x203   :  { %186 = vrot.lane.b32.xlu1 %v1434_v42, %s1331_s1  ;;  %134 = vrot.lane.b32.xlu0 %v1434_v42, %s1332_s9 }
 0x207   :  { %237 = vrot.lane.b32.xlu1 %v1434_v42, %s1333_s10  ;;  %288 = vrot.lane.b32.xlu0 %v1434_v42, %s1334_s11 }
 0x20b   :  { %184 = vrot.lane.b32.xlu1 %v1434_v42, %s1335_s12  ;;  %286 = vrot.lane.b32.xlu0 %v1434_v42, %s1336_s13 }
 0x20f   :  { %235 = vrot.lane.b32.xlu1 %v1434_v42, %s1337_s14 }
 0x275   :  { %v187_v44 = vpop.permute.xlu1 %186  ;;  %v135_v45 = vpop.permute.xlu0 %134 }
 0x276   :  { %v141_v46 = vsel %vm136_vm2, %v135_v45, 0  ;;  %v192_v50 = vsel %vm136_vm2, %v187_v44, 0 }
 0x277   :  { %1147 = vmatpush3.bf16.xpose.msra.mxu0 %v141_v46 }
 0x278   :  { %1152 = vmatprep.subr.bf16.mxu0 %v1329_v15 }
 0x279   :  { %v238_v47 = vpop.permute.xlu1 %237  ;;  %v289_v52 = vpop.permute.xlu0 %288 }
 0x27a   :  { %v243_v48 = vsel %vm136_vm2, %v238_v47, 0  ;;  %v294_v53 = vsel %vm136_vm2, %v289_v52, 0 }
 0x27b   :  { %1159 = vmatpush3.bf16.xpose.msra.mxu1 %v243_v48 }
 0x27c   :  { %1170 = vmatprep.subr.bf16.mxu1 %v1329_v15 }
 0x27d   :  { %v185_v49 = vpop.permute.xlu1 %184  ;;  %v287_v54 = vpop.permute.xlu0 %286 }
 0x27e   :  { %1149 = vmatmul.mubr.msk.bf16.vlgmr.msra.gmra.mxu0 %vm136_vm2, %v1434_v42 }
 0x27f   :  { %1153 = vmatpush3.bf16.xpose.msra.mxu0 %v192_v50  ;;  %1154 = vmatprep.mubr.msk.bf16.mxu0 %vm1330_vm1, %v1329_v15 }
 0x280   :  { %1164 = vmatprep.subr.bf16.mxu0 %v1329_v15 }
 0x281   :  { %v236_v51 = vpop.permute.xlu1 %235 }
 0x282   :  { %1161 = vmatmul.mubr.msk.bf16.vlgmr.msra.gmra.mxu1 %vm136_vm2, %v236_v51 }
 0x283   :  { %1172 = vmatprep.mubr.msk.bf16.mxu1 %vm1330_vm1, %v1329_v15 }
 0x286   :  { %1155 = vmatmul.mubr.msk.bf16.vlgmr.msra.gmra.mxu0 %vm136_vm2, %v185_v49 }
 0x287   :  { %1165 = vmatpush3.bf16.xpose.msra.mxu0 %v294_v53  ;;  %1166 = vmatprep.mubr.msk.bf16.mxu0 %vm1330_vm1, %v1329_v15 }
 0x288   :  { %1176 = vmatprep.subr.bf16.mxu0 %v1329_v15 }
 0x28e   :  { %1167 = vmatmul.mubr.msk.bf16.vlgmr.msra.gmra.mxu0 %vm136_vm2, %v287_v54  ;;  %vm368_vm2 = vcmp.eq.s32.totalorder %v359_v17, %v1471_v62 }
 0x28f   :  { %1178 = vmatprep.mubr.msk.bf16.mxu0 %vm1330_vm1, %v1329_v15  ;;  %vm384_vm7 = vmand %vm368_vm2, %vm376_vm3  ;;  %vm669_vm2 = vcmask 191616   ;;  %vm731_vm3 = vcmask 257216  }
 0x33e   :  { %v177_v10 = vpop.f32.mrf.mxu0 }
 0x33f   :  { %v1483_v11 = vsel %vm381_vm5, %v177_v10, -1e+30  ;;  %vm378_vm5 = vcmp.le.s32.totalorder %v1467_v57, %v353_v12 }
 0x340   :  { %v1150_v13 = vpop.f32.mrf.mxu0  ;;  %v398_v14 = vsel %vm397_vm6, %v1483_v11, -inf  ;;  %vm386_vm10 = vmand %vm370_vm4, %vm378_vm5 }
 0x341   :  { %399 = vmax.xlane.f32.xlu1 %v398_v14 }
 0x342   :  { %v180_v20 = vpop.f32.mrf.mxu0  ;;  %v279_v21 = vpop.f32.mrf.mxu1 }
 0x343   :  { %v390_v22 = vsel %vm382_vm11, %v180_v20, -1e+30  ;;  %v393_v23 = vsel %vm385_vm12, %v279_v21, -1e+30  ;;  %vm387_vm11 = vmand %vm371_vm8, %vm379_vm9  ;;  %vm372_vm12 = vcmp.eq.s32.totalorder %v363_v39, %v1471_v62 }
 0x344   :  { %v1151_v27 = vpop.f32.mrf.mxu0  ;;  %v1162_v28 = vpop.f32.mrf.mxu1  ;;  %v410_v29 = vsel %vm397_vm6, %v393_v23, -inf  ;;  %v401_v30 = vsel %vm397_vm6, %v390_v22, -inf  ;;  %vm388_vm14 = vmand %vm372_vm12, %vm380_vm13 }
 0x345   :  { %411 = vmax.xlane.f32.xlu1 %v410_v29  ;;  %402 = vmax.xlane.f32.xlu0 %v401_v30 }
 0x346   :  { %v228_v33 = vpop.f32.mrf.mxu0  ;;  %v282_v34 = vpop.f32.mrf.mxu1 }
 0x347   :  { %v391_v35 = vsel %vm383_vm15, %v228_v33, -1e+30  ;;  %v394_v45 = vsel %vm386_vm10, %v282_v34, -1e+30  ;;  %vm545_vm15 = vcmask 60416  }
 0x348   :  { %v1156_v36 = vpop.f32.mrf.mxu0  ;;  %v1163_v37 = vpop.f32.mrf.mxu1  ;;  %v404_v38 = vsel %vm397_vm6, %v391_v35, -inf  ;;  %v413_v49 = vsel %vm397_vm6, %v394_v45, -inf }
 0x349   :  { %405 = vmax.xlane.f32.xlu0 %v404_v38 }
 0x34a   :  { %v231_v40 = vpop.f32.mrf.mxu0 }
 0x34b   :  { %v392_v41 = vsel %vm384_vm7, %v231_v40, -1e+30 }
 0x34c   :  { %v1157_v43 = vpop.f32.mrf.mxu0  ;;  %v407_v44 = vsel %vm397_vm6, %v392_v41, -inf }
 0x34d   :  { %408 = vmax.xlane.f32.xlu0 %v407_v44 }
 0x34e   :  { %v330_v46 = vpop.f32.mrf.mxu0 }
 0x34f   :  { %v395_v47 = vsel %vm387_vm11, %v330_v46, -1e+30 }
 0x350   :  { %v1168_v48 = vpop.f32.mrf.mxu0  ;;  %v416_v50 = vsel %vm397_vm6, %v395_v47, -inf }
 0x351   :  { %414 = vmax.xlane.f32.xlu0 %v413_v49  ;;  %417 = vmax.xlane.f32.xlu1 %v416_v50 }
 0x352   :  { %v333_v51 = vpop.f32.mrf.mxu0 }
 0x353   :  { %v396_v52 = vsel %vm388_vm14, %v333_v51, -1e+30 }
 0x354   :  { %v1169_v53 = vpop.f32.mrf.mxu0  ;;  %v419_v54 = vsel %vm397_vm6, %v396_v52, -inf }
 0x355   :  { %420 = vmax.xlane.f32.xlu0 %v419_v54 }
 0x362   :  { %490 = vrot.lane.b32.xlu1 %v1434_v42, %s1338_s15 }
 0x3ca   :  { %v400_v55 = vpop.xlane.xlu1 %399 }
 0x3cb   :  { %v422_v56 = vsub.f32 %v1483_v11, %v400_v55 }
 0x3cd   :  { %v430_v57 = vmul.f32 1.442695, %v422_v56 }
 0x3ce   :  { %v412_v58 = vpop.xlane.xlu1 %411  ;;  %v403_v59 = vpop.xlane.xlu0 %402 }
 0x3cf   :  { %1267 = vpow2.f32 %v430_v57  ;;  %v426_v60 = vsub.f32 %v393_v23, %v412_v58  ;;  %v423_v61 = vsub.f32 %v390_v22, %v403_v59 }
 0x3d1   :  { %v438_v62 = vmul.f32 1.442695, %v426_v60  ;;  %v432_v63 = vmul.f32 1.442695, %v423_v61 }
 0x3d2   :  { %v406_v2 = vpop.xlane.xlu0 %405 }
 0x3d3   :  { %1269 = vpow2.f32 %v438_v62  ;;  %v424_v3 = vsub.f32 %v391_v35, %v406_v2 }
 0x3d4   :  { %1271 = vpow2.f32 %v432_v63 }
 0x3d5   :  { %v434_v4 = vmul.f32 1.442695, %v424_v3 }
 0x3d6   :  { %v409_v5 = vpop.xlane.xlu0 %408 }
 0x3d7   :  { %1273 = vpow2.f32 %v434_v4  ;;  %v425_v6 = vsub.f32 %v392_v41, %v409_v5 }
 0x3d9   :  { %v436_v12 = vmul.f32 1.442695, %v425_v6 }
 0x3da   :  { %v415_v7 = vpop.xlane.xlu0 %414  ;;  %v418_v8 = vpop.xlane.xlu1 %417 }
 0x3db   :  { %v427_v9 = vsub.f32 %v394_v45, %v415_v7  ;;  %v428_v10 = vsub.f32 %v395_v47, %v418_v8 }
 0x3dc   :  { %v1268_v11 = vpop.eup %1267 }
 0x3dd   :  { %v440_v13 = vmul.f32 1.442695, %v427_v9  ;;  %v442_v14 = vmul.f32 1.442695, %v428_v10  ;;  %v446_v16 = vsel %vm397_vm6, %v1268_v11, 0.0 }
 0x3de   :  { %447 = vadd.xlane.f32.xlu1 %v446_v16  ;;  %v491_v17 = vpop.permute.xlu1 %490  ;;  %v421_v18 = vpop.xlane.xlu0 %420 }
 0x3df   :  { %1275 = vpow2.f32 %v440_v13  ;;  %v429_v19 = vsub.f32 %v396_v52, %v421_v18  ;;  %1171 = vmatpush3.bf16.msra.mxu1 %v491_v17 }
 0x3e0   :  { %v1514_v20 = vpop.eup %1269  ;;  %1277 = vpow2.f32 %v442_v14  ;;  %1182 = vmatprep.subr.bf16.mxu1 %v1329_v15 }
 0x3e1   :  { %v1272_v21 = vpop.eup %1271  ;;  %1279 = vpow2.f32 %v436_v12  ;;  %v444_v22 = vmul.f32 1.442695, %v429_v19  ;;  %v458_v23 = vsel %vm397_vm6, %v1514_v20, 0.0 }
 0x3e2   :  { %459 = vadd.xlane.f32.xlu1 %v458_v23  ;;  %v449_v25 = vsel %vm397_vm6, %v1272_v21, 0.0 }
 0x3e3   :  { %450 = vadd.xlane.f32.xlu0 %v449_v25  ;;  %1281 = vpow2.f32 %v444_v22  ;;  %v1251_v22 = vld [vmem:[%s1637_s4] sm:$0xff]  }
 0x3e4   :  { %v1274_v27 = vpop.eup %1273 }
 0x3e5   :  { %v452_v28 = vsel %vm397_vm6, %v1274_v27, 0.0 }
 0x3e6   :  { %453 = vadd.xlane.f32.xlu1 %v452_v28 }
 0x3ec   :  { %v1276_v29 = vpop.eup %1275 }
 0x3ed   :  { %v1521_v30 = vpop.eup %1277  ;;  %v461_v31 = vsel %vm397_vm6, %v1276_v29, 0.0 }
 0x3ee   :  { %v1280_v32 = vpop.eup %1279  ;;  %v464_v33 = vsel %vm397_vm6, %v1521_v30, 0.0  ;;  %462 = vadd.xlane.f32.xlu0 %v461_v31 }
 0x3ef   :  { %465 = vadd.xlane.f32.xlu1 %v464_v33  ;;  %v455_v34 = vsel %vm397_vm6, %v1280_v32, 0.0 }
 0x3f0   :  { %v1282_v35 = vpop.eup %1281 }
 0x3f1   :  { %v467_v36 = vsel %vm397_vm6, %v1282_v35, 0.0 }
 0x3f2   :  { %456 = vadd.xlane.f32.xlu0 %v455_v34 }
 0x3f6   :  { %468 = vadd.xlane.f32.xlu0 %v467_v36 }
 0x400   :  { %610 = vrot.lane.b32.xlu1 %v1434_v42, %s1339_s16 }
 0x404   :  { %672 = vrot.lane.b32.xlu1 %v1434_v42, %s1340_s17 }
 0x40c   :  { %548 = vrot.lane.b32.xlu0 %v1434_v42, %s1341_s18 }
 0x467   :  { %v448_v37 = vpop.xlane.xlu1 %447 }
 0x468   :  { %1283 = vrcp.f32 %v448_v37 }
 0x46b   :  { %v460_v39 = vpop.xlane.xlu1 %459 }
 0x46c   :  { %v451_v38 = vpop.xlane.xlu0 %450 }
 0x46d   :  { %1285 = vrcp.f32 %v451_v38 }
 0x46e   :  { %1287 = vrcp.f32 %v460_v39 }
 0x46f   :  { %v454_v40 = vpop.xlane.xlu1 %453 }
 0x475   :  { %v1284_v43 = vpop.eup %1283 }
 0x476   :  { %v478_v47 = vmul.f32 %v1284_v43, %v1268_v11  ;;  %v742_v43 = vsub.s32 4, %v1420_v24 }
 0x477   :  { %v463_v41 = vpop.xlane.xlu0 %462 }
 0x478   :  { %1289 = vrcp.f32 %v463_v41  ;;  %v466_v44 = vpop.xlane.xlu1 %465 }
 0x479   :  { %1291 = vrcp.f32 %v454_v40 }
 0x47a   :  { %v1286_v45 = vpop.eup %1285 }
 0x47b   :  { %v457_v46 = vpop.xlane.xlu0 %456  ;;  %v479_v48 = vmul.f32 %v1286_v45, %v1272_v21  ;;  %v1288_v51 = vpop.eup %1287 }
 0x47c   :  { %1293 = vrcp.f32 %v457_v46  ;;  %v611_v50 = vpop.permute.xlu1 %610  ;;  %v482_v54 = vmul.f32 %v1288_v51, %v1514_v20  ;;  %v1250_v20 = vld [vmem:[%s1637_s4 + $0x8] sm:$0xff]  }
 0x47d   :  { %v486_v49 = vpack.c.bf16 %v479_v48, %v478_v47 }
 0x47f   :  { %1173 = vmatmul.mubr.msk.bf16.vlgmr.msra.gmra.mxu1 %vm397_vm6, %v486_v49  ;;  %v469_v42 = vpop.xlane.xlu0 %468 }
 0x480   :  { %1183 = vmatpush3.bf16.msra.mxu1 %v611_v50  ;;  %1295 = vrcp.f32 %v469_v42  ;;  %1184 = vmatprep.mubr.msk.bf16.mxu1 %vm1330_vm1, %v1329_v15  ;;  %v673_v63 = vpop.permute.xlu1 %672 }
 0x481   :  { %1194 = vmatprep.subr.bf16.mxu1 %v1329_v15  ;;  %1297 = vrcp.f32 %v466_v44  ;;  %v743_v44 = vrot.slane %v1426_v26, %v742_v43 }
 0x483   :  { %v549_v52 = vpop.permute.xlu0 %548 }
 0x484   :  { %1177 = vmatpush3.bf16.msra.mxu0 %v549_v52 }
 0x485   :  { %v1290_v53 = vpop.eup %1289  ;;  %1188 = vmatprep.subr.bf16.mxu0 %v1329_v15 }
 0x486   :  { %v483_v55 = vmul.f32 %v1290_v53, %v1276_v29  ;;  %v1292_v56 = vpop.eup %1291 }
 0x487   :  { %v480_v59 = vmul.f32 %v1292_v56, %v1274_v27 }
 0x488   :  { %v488_v57 = vpack.c.bf16 %v483_v55, %v482_v54 }
 0x489   :  { %v1294_v58 = vpop.eup %1293 }
 0x48a   :  { %1185 = vmatmul.mubr.msk.bf16.vlgmr.msra.gmra.mxu1 %vm397_vm6, %v488_v57  ;;  %v481_v60 = vmul.f32 %v1294_v58, %v1280_v32 }
 0x48b   :  { %1198 = vmatprep.mubr.msk.bf16.mxu1 %vm1330_vm1, %v1329_v15  ;;  %1195 = vmatpush3.bf16.msra.mxu1 %v1250_v20 }
 0x48c   :  { %v487_v61 = vpack.c.bf16 %v481_v60, %v480_v59  ;;  %1196 = vmatprep.subr.bf16.mxu1 %v1329_v15 }
 0x48d   :  { %v1296_v62 = vpop.eup %1295 }
 0x48e   :  { %1179 = vmatmul.mubr.msk.bf16.vlgmr.msra.gmra.mxu0 %vm397_vm6, %v487_v61  ;;  %v1298_v2 = vpop.eup %1297  ;;  %v485_v3 = vmul.f32 %v1296_v62, %v1282_v35  ;;  %v1253_v62 = vld [vmem:[%s1638_s5 + $0x8] sm:$0xff]  }
 0x48f   :  { %1189 = vmatpush3.bf16.msra.mxu0 %v673_v63  ;;  %1190 = vmatprep.mubr.msk.bf16.mxu0 %vm1330_vm1, %v1329_v15  ;;  %v484_v4 = vmul.f32 %v1298_v2, %v1521_v30  ;;  %v1254_v63 = vld [vmem:[%s1638_s5] sm:$0xff]  }
 0x490   :  { %1202 = vmatprep.subr.bf16.mxu0 %v1329_v15  ;;  %1197 = vmatpush3.bf16.msra.mxu1 %v1251_v22  ;;  %v1255_v22 = vld [vmem:[%s1639_s6 + $0x38] sm:$0xff]  }
 0x491   :  { %v489_v5 = vpack.c.bf16 %v485_v3, %v484_v4  ;;  %1210 = vmatprep.subr.bf16.mxu1 %v1329_v15 }
 0x496   :  { %1191 = vmatmul.mubr.msk.bf16.vlgmr.msra.gmra.mxu0 %vm397_vm6, %v489_v5  ;;  %vm607_vm6 = vcmask 126016  }
 0x497   :  { %1206 = vmatprep.mubr.msk.bf16.mxu0 %vm1330_vm1, %v1329_v15  ;;  %1203 = vmatpush3.bf16.msra.mxu0 %v1253_v62 }
 0x498   :  { %1204 = vmatprep.subr.bf16.mxu0 %v1329_v15 }
 0x49b   :  { %1205 = vmatpush3.bf16.msra.mxu0 %v1254_v63 }
 0x53f   :  { %v530_v6 = vpop.f32.mrf.mxu1 }
 0x540   :  { %v1096_v7 = vpack.c.bf16 %v530_v6, %v530_v6 }
 0x541   :  { %v1174_v8 = vpop.f32.mrf.mxu1 }
 0x542   :  { %546 = vst.msk [vmem:[#allocation2] sm:$0xf] %vm545_vm15, %v1096_v7  ;;  %v835_v8 = vsub.s32 2, %v1420_v24 }
 0x543   :  { %v533_v9 = vpop.f32.mrf.mxu1 }
 0x544   :  { %v1097_v10 = vpack.c.bf16 %v533_v9, %v533_v9 }
 0x545   :  { %v1175_v11 = vpop.f32.mrf.mxu1 }
 0x546   :  { %547 = vst.msk [vmem:[#allocation2 + $0x4] sm:$0xf] %vm545_vm15, %v1097_v10  ;;  %v836_v11 = vrot.slane %v1426_v26, %v835_v8 }
 0x54a   :  { %v650_v12 = vpop.f32.mrf.mxu1 }
 0x54b   :  { %v1100_v23 = vpack.c.bf16 %v650_v12, %v650_v12  ;;  %v841_v12 = vsub.s32 3, %v1420_v24 }
 0x54c   :  { %v1186_v13 = vpop.f32.mrf.mxu1 }
 0x54e   :  { %v588_v14 = vpop.f32.mrf.mxu0  ;;  %v653_v16 = vpop.f32.mrf.mxu1 }
 0x54f   :  { %v1098_v17 = vpack.c.bf16 %v588_v14, %v588_v14  ;;  %v1101_v29 = vpack.c.bf16 %v653_v16, %v653_v16 }
 0x550   :  { %v1180_v18 = vpop.f32.mrf.mxu0  ;;  %v1187_v19 = vpop.f32.mrf.mxu1 }
 0x551   :  { %601 = vrot.lane.b32.xlu1 %v1098_v17, %s1342_s21  ;;  %v842_v17 = vrot.slane %v1426_v26, %v841_v12 }
 0x552   :  { %v591_v21 = vpop.f32.mrf.mxu0 }
 0x553   :  { %v1099_v25 = vpack.c.bf16 %v591_v21, %v591_v21 }
 0x554   :  { %v1181_v27 = vpop.f32.mrf.mxu0 }
 0x555   :  { %663 = vrot.lane.b32.xlu1 %v1100_v23, %s1343_s24  ;;  %603 = vrot.lane.b32.xlu0 %v1099_v25, %s1342_s21  ;;  %v1256_v23 = vld [vmem:[%s1639_s6 + $0x30] sm:$0xff]   ;;  %v1257_v25 = vld [vmem:[%s1639_s6 + $0x28] sm:$0xff]  }
 0x556   :  { %v712_v28 = vpop.f32.mrf.mxu0  ;;  %v1258_v27 = vld [vmem:[%s1639_s6 + $0x20] sm:$0xff]  }
 0x557   :  { %v1102_v30 = vpack.c.bf16 %v712_v28, %v712_v28  ;;  %v1259_v28 = vld [vmem:[%s1639_s6 + $0x18] sm:$0xff]  }
 0x558   :  { %v1192_v31 = vpop.f32.mrf.mxu0 }
 0x559   :  { %665 = vrot.lane.b32.xlu0 %v1101_v29, %s1343_s24  ;;  %725 = vrot.lane.b32.xlu1 %v1102_v30, %s1344_s25  ;;  %v1260_v29 = vld [vmem:[%s1639_s6 + $0x10] sm:$0xff]   ;;  %v1261_v30 = vld [vmem:[%s1639_s6 + $0x8] sm:$0xff]  }
 0x55a   :  { %v715_v32 = vpop.f32.mrf.mxu0  ;;  %v1262_v31 = vld [vmem:[%s1639_s6] sm:$0xff]  }
 0x55b   :  { %v1103_v33 = vpack.c.bf16 %v715_v32, %v715_v32  ;;  %v1084_v32 = vld [vmem:[%s1635_s2] ss:$0 sm:$0xff]  ;;  %s1345_s2 = smov [#allocation3]  }
 0x55c   :  { %v1193_v34 = vpop.f32.mrf.mxu0  ;;  %s1050_s6 = sshll.u32 %s1345_s2, 4  ;;  %s1051_s6 = int_to_ptr.vmem [resolvable:$true] %s1050_s6 }
 0x55d   :  { %727 = vrot.lane.b32.xlu0 %v1103_v33, %s1344_s25  ;;  %s1307_s20 = scalar_lea.vmem %s1051_s6, 256  ;;  %p1312_p1 = scmp.lt.s32.totalorder %s1051_s6, %s1051_s6 }
 0x55e   :  { %p1308_p0 = scmp.ne.s32.totalorder %s1051_s6, %s1307_s20  ;;  %p1313_p2 = scmp.lt.s32.totalorder %s1307_s20, %s1307_s20 }
 0x560   :  { %p1314_p3 = por %p1313_p2, %p1312_p1 }
 0x562   :  { %p1315_p4 = pnand %p1314_p3, %p1308_p0 }
 0x5c3   :  { %v602_v35 = vpop.permute.xlu1 %601 }
 0x5c4   :  { %608 = vst.msk [vmem:[#allocation2] sm:$0xf] %vm607_vm6, %v602_v35 }
 0x5c7   :  { %v664_v36 = vpop.permute.xlu1 %663  ;;  %v604_v37 = vpop.permute.xlu0 %603 }
 0x5c8   :  { %670 = vst.msk [vmem:[#allocation2] sm:$0xf] %vm669_vm2, %v664_v36 }
 0x5c9   :  { %609 = vst.msk [vmem:[#allocation2 + $0x4] sm:$0xf] %vm607_vm6, %v604_v37 }
 0x5cb   :  { %v666_v38 = vpop.permute.xlu0 %665  ;;  %v726_v39 = vpop.permute.xlu1 %725 }
 0x5cc   :  { %671 = vst.msk [vmem:[#allocation2 + $0x4] sm:$0xf] %vm669_vm2, %v666_v38 }
 0x5cd   :  { %732 = vst.msk [vmem:[#allocation2] sm:$0xf] %vm731_vm3, %v726_v39 }
 0x5cf   :  { %v728_v40 = vpop.permute.xlu0 %727 }
 0x5d0   :  { %733 = vst.msk [vmem:[#allocation2 + $0x4] sm:$0xf] %vm731_vm3, %v728_v40 }
 0x5d7   :  { %v1252_v41 = vld [vmem:[#allocation2] sm:$0xff]  }
 0x5d8   :  { %1199 = vmatmul.mubr.msk.bf16.vlgmr.msra.gmra.mxu1 %vm31_vm0, %v1252_v41 }
 0x5d9   :  { %1226 = vmatprep.mubr.msk.bf16.mxu1 %vm1330_vm1, %v1329_v15  ;;  %1211 = vmatpush3.bf16.msra.mxu1 %v1255_v22 }
 0x5da   :  { %1212 = vmatprep.subr.bf16.mxu1 %v1329_v15 }
 0x5dd   :  { %1213 = vmatpush3.bf16.msra.mxu1 %v1256_v23 }
 0x5de   :  { %1214 = vmatprep.subr.bf16.mxu1 %v1329_v15 }
 0x5e1   :  { %1215 = vmatpush3.bf16.msra.mxu1 %v1257_v25 }
 0x5e2   :  { %1216 = vmatprep.subr.bf16.mxu1 %v1329_v15 }
 0x5e5   :  { %1217 = vmatpush3.bf16.msra.mxu1 %v1258_v27 }
 0x5e6   :  { %1218 = vmatprep.subr.bf16.mxu1 %v1329_v15 }
 0x5e9   :  { %1219 = vmatpush3.bf16.msra.mxu1 %v1259_v28 }
 0x5ea   :  { %1220 = vmatprep.subr.bf16.mxu1 %v1329_v15 }
 0x5ed   :  { %1221 = vmatpush3.bf16.msra.mxu1 %v1260_v29 }
 0x5ee   :  { %1222 = vmatprep.subr.bf16.mxu1 %v1329_v15 }
 0x5f1   :  { %1223 = vmatpush3.bf16.msra.mxu1 %v1261_v30 }
 0x5f2   :  { %1224 = vmatprep.subr.bf16.mxu1 %v1329_v15 }
 0x5f5   :  { %1225 = vmatpush3.bf16.msra.mxu1 %v1262_v31 }
 0x698   :  { %v798_v45 = vpop.f32.mrf.mxu1 }
 0x699   :  { %v799_v46 = vadd.f32 %v798_v45, %v743_v44 }
 0x69a   :  { %v1200_v47 = vpop.f32.mrf.mxu1 }
 0x69b   :  { %v1564_v48 = vadd.f32 %v799_v46, %v1390_v0 }
 0x69c   :  { %v801_v49 = vpop.f32.mrf.mxu1 }
 0x69d   :  { %v802_v50 = vadd.f32 %v801_v49, %v743_v44  ;;  %v807_v42 = vsel %vm31_vm0, %v1564_v48, 0.0 }
 0x69e   :  { %808 = vadd.xlane.f32.xlu1 %v807_v42  ;;  %v1201_v51 = vpop.f32.mrf.mxu1 }
 0x69f   :  { %v1569_v52 = vadd.f32 %v802_v50, %v1395_v1 }
 0x6a1   :  { %v810_v53 = vsel %vm31_vm0, %v1569_v52, 0.0 }
 0x6a2   :  { %811 = vadd.xlane.f32.xlu0 %v810_v53 }
 0x727   :  { %v809_v54 = vpop.xlane.xlu1 %808 }
 0x728   :  { %v813_v55 = vmul.f32 0.03125, %v809_v54 }
 0x72a   :  { %v815_v56 = vsub.f32 %v1564_v48, %v813_v55 }
 0x72b   :  { %v812_v0 = vpop.xlane.xlu0 %811 }
 0x72c   :  { %v814_v57 = vmul.f32 0.03125, %v812_v0  ;;  %v817_v58 = vmul.f32 %v815_v56, %v815_v56 }
 0x72e   :  { %v816_v59 = vsub.f32 %v1569_v52, %v814_v57  ;;  %v819_v60 = vsel %vm31_vm0, %v817_v58, 0.0  ;;  %v950_v58 = vsub.s32 5, %v1420_v24 }
 0x72f   :  { %820 = vadd.xlane.f32.xlu0 %v819_v60 }
 0x730   :  { %v818_v61 = vmul.f32 %v816_v59, %v816_v59 }
 0x732   :  { %v822_v1 = vsel %vm31_vm0, %v818_v61, 0.0 }
 0x733   :  { %823 = vadd.xlane.f32.xlu0 %v822_v1 }
 0x7b8   :  { %v821_v2 = vpop.xlane.xlu0 %820 }
 0x7b9   :  { %v825_v3 = vmul.f32 0.03125, %v821_v2 }
 0x7bb   :  { %v827_v4 = vadd.f32 1e-05, %v825_v3 }
 0x7bc   :  { %v824_v5 = vpop.xlane.xlu0 %823 }
 0x7bd   :  { %1299 = vrsqrt.f32 %v827_v4  ;;  %v826_v6 = vmul.f32 0.03125, %v824_v5 }
 0x7bf   :  { %v828_v7 = vadd.f32 1e-05, %v826_v6 }
 0x7c1   :  { %1301 = vrsqrt.f32 %v828_v7 }
 0x7ca   :  { %v1300_v9 = vpop.eup %1299 }
 0x7cb   :  { %v831_v10 = vmul.f32 %v1300_v9, %v815_v56 }
 0x7cd   :  { %v837_v16 = vmul.f32 %v836_v11, %v831_v10 }
 0x7ce   :  { %v1302_v13 = vpop.eup %1301 }
 0x7cf   :  { %v832_v14 = vmul.f32 %v1302_v13, %v816_v59  ;;  %v843_v19 = vadd.f32 %v842_v17, %v837_v16  ;;  %v951_v59 = vrot.slane %v1426_v26, %v950_v58 }
 0x7d1   :  { %v838_v18 = vmul.f32 %v836_v11, %v832_v14 }
 0x7d3   :  { %v844_v20 = vadd.f32 %v842_v17, %v838_v18 }
 0x7d5   :  { %v845_v21 = vpack.c.bf16 %v844_v20, %v843_v19 }
 0x7d7   :  { %1207 = vmatmul.mubr.msk.bf16.vlgmr.msra.gmra.mxu0 %vm31_vm0, %v845_v21 }
 0x897   :  { %v906_v33 = vpop.f32.mrf.mxu0 }
 0x898   :  { %v907_v34 = vadd.f32 %v1084_v32, %v906_v33 }
 0x899   :  { %v1208_v35 = vpop.f32.mrf.mxu0 }
 0x89a   :  { %v915_v36 = vmul.f32 0.044715, %v907_v34  ;;  %v913_v53 = vmul.f32 0.5, %v907_v34 }
 0x89b   :  { %v909_v37 = vpop.f32.mrf.mxu0 }
 0x89c   :  { %v917_v38 = vmul.f32 %v915_v36, %v907_v34  ;;  %v910_v39 = vadd.f32 %v1084_v32, %v909_v37 }
 0x89d   :  { %v1209_v40 = vpop.f32.mrf.mxu0 }
 0x89e   :  { %v919_v41 = vmul.f32 %v917_v38, %v907_v34  ;;  %v916_v43 = vmul.f32 0.044715, %v910_v39  ;;  %v914_v54 = vmul.f32 0.5, %v910_v39 }
 0x8a0   :  { %v921_v44 = vadd.f32 %v919_v41, %v907_v34  ;;  %v918_v45 = vmul.f32 %v916_v43, %v910_v39 }
 0x8a2   :  { %v923_v46 = vmul.f32 0.7978846, %v921_v44  ;;  %v920_v47 = vmul.f32 %v918_v45, %v910_v39 }
 0x8a4   :  { %1303 = vtanh.f32 %v923_v46  ;;  %v922_v15 = vadd.f32 %v920_v47, %v910_v39 }
 0x8a6   :  { %v924_v49 = vmul.f32 0.7978846, %v922_v15 }
 0x8a8   :  { %1305 = vtanh.f32 %v924_v49 }
 0x8b1   :  { %v1304_v50 = vpop.eup %1303 }
 0x8b2   :  { %v927_v42 = vadd.f32 1.0, %v1304_v50 }
 0x8b4   :  { %v929_v56 = vmul.f32 %v927_v42, %v913_v53 }
 0x8b5   :  { %v1306_v51 = vpop.eup %1305 }
 0x8b6   :  { %v928_v55 = vadd.f32 1.0, %v1306_v51 }
 0x8b8   :  { %v930_v0 = vmul.f32 %v928_v55, %v914_v54 }
 0x8ba   :  { %v931_v57 = vpack.c.bf16 %v930_v0, %v929_v56 }
 0x8bc   :  { %1227 = vmatmul.mubr.bf16.vlgmr.msra.gmra.mxu1 %v931_v57 }
 0x97c   :  { %v1034_v60 = vpop.f32.mrf.mxu1 }
 0x97d   :  { %v1035_v61 = vadd.f32 %v1034_v60, %v951_v59 }
 0x97e   :  { %v1228_v1 = vpop.f32.mrf.mxu1 }
 0x97f   :  { %v1041_v62 = vadd.f32 %v1035_v61, %v1564_v48 }
 0x980   :  { %v1037_v63 = vpop.f32.mrf.mxu1 }
 0x981   :  { %1043 = vst.msk [vmem:[#allocation3] sm:$0xff] %vm31_vm0, %v1041_v62  ;;  %v1038_v2 = vadd.f32 %v1037_v63, %v951_v59 }
 0x982   :  { %v1229_v3 = vpop.f32.mrf.mxu1 }
 0x983   :  { %v1042_v4 = vadd.f32 %v1038_v2, %v1569_v52 }
 0x985   :  { %1044 = vst.msk [vmem:[#allocation3 + $0x8] sm:$0xff] %vm31_vm0, %v1042_v4 }
 0x986   :  { %1318 = shalt.err (!%p1315_p4)
}
 0x987   :  { %s1346_s22 = smov 128  }
 0x988   :  { %1056 = dma.vmem_to_hbm [thread:$0]  %s1051_s6, 256, %s1640_s7, [#allocation4], %s1346_s22, %s1346_s22, %s1342_s21  }
 0x989   :  { %1327 = dma.done.wait [#allocation4], 256  }
 0x98a   :  { %1328 = vsyncadd [#allocation4], 4294967040 }
 0x98b   :  { %1060 = vsyncpa [#allocation4], 1 }

</bundles_post_ra>
